<compile_context>
chip_gen: v6e
topology: v6e:2x2x1
jax: 0.10.0
libtpu: 0.0.40
codegen_flags: <defaults>
</compile_context>

<pallas_src>
import jax
import jax.numpy as jnp
from jax import lax
from jax.experimental import pallas as pl
from jax.experimental.pallas import tpu as pltpu

_LANE = 128
_DENSE_RUN_BYTES = 512            # below this spatial run -> lane-dense landing
_SEG_CAP_ELEMS = 128 * 1024       # cap on the block-diagonal ones matrix (512 KiB f32)
_NBUF = 3                         # manual pipeline depth (keeps >=2 DMAs in flight)
_CHUNK_BYTES_CAP = 8 * 1024 * 1024
_VMEM_SLACK = 8 * 1024 * 1024     # headroom for weights / constants / compiler scratch


def _round_up(x, m):
    return ((x + m - 1) // m) * m


def _vmem_capacity_bytes():
    # v5e/v6e: 128 MiB, v7x: 64 MiB.  Conservative fallback if query unavailable.
    try:
        info = pltpu.get_tpu_info()
        for attr in ("vmem_capacity_bytes", "vmem_size_bytes", "vmem_bytes"):
            v = getattr(info, attr, None)
            if v:
                return int(v)
    except Exception:
        pass
    return 64 * 1024 * 1024


def _stable_sigmoid(x):
    # sigmoid(x) without inf intermediates: exp() only sees non-positive args.
    e = jnp.exp(-jnp.abs(x))            # EUP slot; e <= 1, never overflows
    p = 1.0 / (1.0 + e)
    return jnp.where(x >= 0, p, 1.0 - p)


# ----------------------------------------------------------------------------
# Static planning (all Python ints; runs at trace time)
# ----------------------------------------------------------------------------
def _build_plan(x_shapes, x_dtype, B, has_t, t_dim, F, hid, out):
    itemsize = jnp.dtype(x_dtype).itemsize
    sub = 32 // itemsize                        # sublane multiple: 8 f32 / 16 bf16 / 32 i8
    n_x = len(x_shapes)

    phys = _vmem_capacity_bytes()
    vmem_limit = int(min(phys * 3 // 4, 96 * 1024 * 1024))   # 96 MiB v5e/v6e, 48 MiB v7x

    F_pad = _round_up(F, _LANE)
    fixed = 4 * (B * F_pad                                    # f32 feats accumulator
                 + _round_up(F, 8) * _round_up(hid, _LANE)    # w1 (in, hid)
                 + _round_up(hid, 8) * _round_up(out, _LANE)  # w2 (hid, out)
                 + 2 * _LANE                                  # biases
                 + B * (F_pad + _round_up(out, _LANE)))       # outputs
    buffer_budget = max(vmem_limit - fixed - _VMEM_SLACK, 4 * 1024 * 1024)

    # Landing mode per input: lane-dense ("D") when the spatial run is short.
    modes = ["D" if (S * itemsize < _DENSE_RUN_BYTES) else "S"
             for (_, _, S) in x_shapes]

    # ---- dense pool: whole-channel lane-dense chunks, MXU segment-sum reduce
    dense_cs = {}
    LD = 0
    for i, (_, C, S) in enumerate(x_shapes):
        if modes[i] != "D":
            continue
        cs = max(1, min(C, int((_SEG_CAP_ELEMS // max(S, 1)) ** 0.5)))
        dense_cs[i] = cs
        LD = max(LD, cs * S)
    has_dpool = LD > 0
    LD_pad = _round_up(max(LD, 1), _LANE)
    dpool_bytes = (_NBUF * _round_up(B, sub) * LD_pad * itemsize) if has_dpool else 0

    # ---- strided pool: padded-tile-aware chunk sizing + spatial-split fallback
    strided = [i for i in range(n_x) if modes[i] == "S"]
    has_spool = bool(strided)
    CS_pool, SLs = 1, _LANE
    strided_cs, strided_slen = {}, {}
    if has_spool:
        per_buf = max((buffer_budget - dpool_bytes) // _NBUF,
                      B * sub * _LANE * itemsize)
        per_buf = min(per_buf, _CHUNK_BYTES_CAP)
        # Largest spatial strip (multiple of 128 lanes) one channel may occupy.
        max_lanes = per_buf // (B * sub * itemsize)
        slen_cap = max(_LANE, (max_lanes // _LANE) * _LANE)
        SLs = max(min(_round_up(x_shapes[i][2], _LANE), slen_cap) for i in strided)
        # Channels per chunk such that the *padded* buffer fits the budget.
        cs_budget = per_buf // (B * SLs * itemsize)
        CS_val = max(1, (cs_budget // sub) * sub)
        for i in strided:
            _, C, S = x_shapes[i]
            if _round_up(S, _LANE) <= SLs:
                cs = min(C, CS_val)
                strided_cs[i] = cs
                CS_pool = max(CS_pool, cs)
            else:
                # Even one channel is too big: split spatially, accumulate partials.
                strided_cs[i] = 1
                strided_slen[i] = SLs

    # ---- static job list: (mode, input, c0, csize, s0, slen, feats column)
    jobs = []
    col = 0
    for i, (_, C, S) in enumerate(x_shapes):
        if modes[i] == "D":
            cs = dense_cs[i]
            for c0 in range(0, C, cs):
                jobs.append(("D", i, c0, min(cs, C - c0), 0, S, col + c0))
        elif i in strided_slen:
            sl = strided_slen[i]
            for c0 in range(C):
                for s0 in range(0, S, sl):
                    jobs.append(("SS", i, c0, 1, s0, min(sl, S - s0), col + c0))
        else:
            cs = strided_cs[i]
            for c0 in range(0, C, cs):
                jobs.append(("SC", i, c0, min(cs, C - c0), 0, S, col + c0))
        col += C

    return dict(
        n_x=n_x, has_t=has_t, t_dim=t_dim, F=F, F_pad=F_pad, n_feat_x=col,
        modes=modes, x_shapes=x_shapes, jobs=jobs, nbuf=_NBUF,
        has_spool=has_spool, spool_shape=(_NBUF, B, CS_pool, SLs),
        has_dpool=has_dpool, dpool_shape=(_NBUF, B, LD_pad),
        vmem_limit=vmem_limit,
    )


# ----------------------------------------------------------------------------
# Fused kernel
# ----------------------------------------------------------------------------
def _make_kernel(plan):
    n_x = plan["n_x"]
    has_t = plan["has_t"]
    has_spool = plan["has_spool"]
    has_dpool = plan["has_dpool"]
    jobs = plan["jobs"]
    nbuf = plan["nbuf"]
    x_shapes = plan["x_shapes"]
    F = plan["F"]
    n_feat_x = plan["n_feat_x"]

    def kernel(*refs):
        idx = 0
        x_refs = refs[idx:idx + n_x]; idx += n_x
        t_ref = None
        if has_t:
            t_ref = refs[idx]; idx += 1
        w1_ref, b1_ref, w2_ref, b2_ref = refs[idx:idx + 4]; idx += 4
        surv_ref, feats_ref = refs[idx:idx + 2]; idx += 2
        spool = None
        if has_spool:
            spool = refs[idx]; idx += 1
        dpool = None
        if has_dpool:
            dpool = refs[idx]; idx += 1
        sem = refs[idx]; idx += 1
        acc_ref = refs[idx]

        # Block-diagonal ones matrices for the lane-dense segment reduce (built
        # once per distinct (S, csize); the otherwise-idle MXU does the sums).
        seg_cache = {}

        def seg_for(S, cs):
            key = (S, cs)
            if key not in seg_cache:
                rows = S * cs
                r = lax.broadcasted_iota(jnp.int32, (rows, cs), 0)
                c = lax.broadcasted_iota(jnp.int32, (rows, cs), 1)
                lo = c * S
                seg_cache[key] = jnp.where(
                    jnp.logical_and(r >= lo, r < lo + S), 1.0, 0.0
                ).astype(jnp.float32)
            return seg_cache[key]

        def make_cp(job, slot):
            mode, i, c0, cs, s0, sl, _col = job
            if mode == "D":                      # lane-dense contiguous chunk
                S = x_shapes[i][2]
                e0, elen = c0 * S, cs * S
                return pltpu.make_async_copy(
                    x_refs[i].at[:, e0:e0 + elen],
                    dpool.at[slot, :, 0:elen],
                    sem.at[slot])
            return pltpu.make_async_copy(        # whole-channel / spatial strip
                x_refs[i].at[:, c0:c0 + cs, s0:s0 + sl],
                spool.at[slot, :, 0:cs, 0:sl],
                sem.at[slot])

        def reduce(job, slot):
            mode, i, c0, cs, s0, sl, col = job
            S = x_shapes[i][2]
            inv = 1.0 / float(S)                 # partial chunks still scale by full S
            if mode == "D":
                elen = cs * S
                chunk = dpool[slot, :, 0:elen].astype(jnp.float32)
                sums = jnp.dot(chunk, seg_for(S, cs),
                               preferred_element_type=jnp.float32)
            else:
                chunk = spool[slot, :, 0:cs, 0:sl].astype(jnp.float32)
                sums = jnp.sum(chunk, axis=-1)
            acc_ref[:, col:col + cs] += sums * inv

        # Lane-padded f32 accumulator; feats is stored once at the very end.
        acc_ref[...] = jnp.zeros_like(acc_ref)

        # ---- streamed GAP: nbuf-deep manual pipeline over the static job list.
        # slot == sem index == global job counter % nbuf; at most nbuf-1 copies
        # in flight.  The prefetch at step k re-targets the slot read at step
        # k-1; Mosaic's ref-effect ordering keeps the DMA start after that read.
        n_jobs = len(jobs)
        for j in range(min(nbuf - 1, n_jobs)):
            make_cp(jobs[j], j % nbuf).start()
        for k in range(n_jobs):
            nxt = k + nbuf - 1
            if nxt < n_jobs:
                make_cp(jobs[nxt], nxt % nbuf).start()
            make_cp(jobs[k], k % nbuf).wait()
            reduce(jobs[k], k % nbuf)
        # TODO(synk): if n_jobs grows to many dozens, switch this unrolled loop
        # to a lax.fori_loop over an SMEM job table (uniform chunk sizes).

        if has_t:
            td = t_ref.shape[-1]
            acc_ref[:, n_feat_x:n_feat_x + td] = t_ref[...].astype(jnp.float32)

        # ---- fused MLP head: dense_1 -> ReLU -> dense_2 -> sigmoid
        # (dropout_1 / dropout_2 are identity in eval mode)
        feats = acc_ref[:, 0:F]
        feats_ref[...] = feats
        h = jnp.dot(feats, w1_ref[...], preferred_element_type=jnp.float32)
        h = jnp.maximum(h + b1_ref[...], 0.0)
        o = jnp.dot(h, w2_ref[...], preferred_element_type=jnp.float32)
        surv_ref[...] = _stable_sigmoid(o + b2_ref[...])

    return kernel


# ----------------------------------------------------------------------------
# Wrapper
# ----------------------------------------------------------------------------
def surv_head_forward(x_in, t, w1_io, b1_2d, w2_io, b2_2d):
    """sigmoid(relu(concat([GAP(x) for x in x_in] + [t]) @ w1_io + b1) @ w2_io + b2)."""
    assert len(x_in) >= 1, "x_in must contain at least one feature map"
    B = int(x_in[0].shape[0])
    x_dtype = x_in[0].dtype
    for x in x_in:
        assert x.ndim == 5 and int(x.shape[0]) == B and x.dtype == x_dtype

    x_shapes = [(B, int(x.shape[1]), int(x.shape[2] * x.shape[3] * x.shape[4]))
                for x in x_in]
    has_t = t is not None
    t_dim = int(t.shape[-1]) if has_t else 0
    F = sum(C for (_, C, _) in x_shapes) + t_dim
    assert int(w1_io.shape[0]) == F, (w1_io.shape, F)
    hid = int(w1_io.shape[1])
    out = int(w2_io.shape[1])

    plan = _build_plan(x_shapes, x_dtype, B, has_t, t_dim, F, hid, out)

    # HBM views: lane-dense (B, C*S) for small-spatial inputs, (B, C, S) otherwise
    # (contiguous reshapes -> no data movement; dtype cast happens IN the kernel).
    x_views = []
    for x, (_, C, S), m in zip(x_in, x_shapes, plan["modes"]):
        x_views.append(x.reshape(B, C * S) if m == "D" else x.reshape(B, C, S))

    kernel = _make_kernel(plan)

    any_spec = pl.BlockSpec(memory_space=pl.ANY)
    vmem_spec = pl.BlockSpec(memory_space=pltpu.MemorySpace.VMEM)
    in_specs = ([any_spec] * len(x_views)
                + ([vmem_spec] if has_t else [])
                + [vmem_spec] * 4)

    scratch_shapes = []
    if plan["has_spool"]:
        scratch_shapes.append(pltpu.VMEM(plan["spool_shape"], x_dtype))
    if plan["has_dpool"]:
        scratch_shapes.append(pltpu.VMEM(plan["dpool_shape"], x_dtype))
    scratch_shapes.append(pltpu.SemaphoreType.DMA((plan["nbuf"],)))
    scratch_shapes.append(pltpu.VMEM((B, plan["F_pad"]), jnp.float32))

    itemsize = jnp.dtype(x_dtype).itemsize
    gap_flops = sum(B * C * S for (_, C, S) in x_shapes)
    mlp_flops = 2 * B * (F * hid + hid * out)
    bytes_accessed = (sum(B * C * S for (_, C, S) in x_shapes) * itemsize
                      + (B * t_dim + F * hid + hid + hid * out + out
                         + B * out + B * F) * 4)
    cost = pl.CostEstimate(flops=gap_flops + mlp_flops,
                           transcendentals=B * out,
                           bytes_accessed=int(bytes_accessed))

    surv, feats = pl.pallas_call(
        kernel,
        out_shape=(jax.ShapeDtypeStruct((B, out), jnp.float32),
                   jax.ShapeDtypeStruct((B, F), jnp.float32)),
        in_specs=in_specs,
        out_specs=(vmem_spec, vmem_spec),
        scratch_shapes=scratch_shapes,
        compiler_params=pltpu.CompilerParams(
            vmem_limit_bytes=int(plan["vmem_limit"])),
        cost_estimate=cost,
    )(*x_views, *((t,) if has_t else ()), w1_io, b1_2d, w2_io, b2_2d)
    return surv, feats


class SurvHeadPallas:
    def __init__(self, channel_num: int, interval_num: int, is_seg: bool,
                 t_dim: int, key):
        in_dim = channel_num * (15 if is_seg else 8) + t_dim
        hid_dim = channel_num * 8
        k1, k2, k3, k4 = jax.random.split(key, 4)
        # PyTorch nn.Linear default init: U(-1/sqrt(fan_in), 1/sqrt(fan_in)),
        # weight stored as (out, in) — kept in that layout for reg_weight.
        lim1 = 1.0 / (in_dim ** 0.5)
        lim2 = 1.0 / (hid_dim ** 0.5)
        self.w1 = jax.random.uniform(k1, (hid_dim, in_dim), jnp.float32, -lim1, lim1)
        self.b1 = jax.random.uniform(k2, (hid_dim,), jnp.float32, -lim1, lim1)
        self.w2 = jax.random.uniform(k3, (interval_num, hid_dim), jnp.float32, -lim2, lim2)
        self.b2 = jax.random.uniform(k4, (interval_num,), jnp.float32, -lim2, lim2)
        # Kernel-layout copies built ONCE at init (no per-call XLA glue).
        self.w1_io = jnp.asarray(self.w1.T)                    # (in, hid)
        self.w2_io = jnp.asarray(self.w2.T)                    # (hid, out)
        self.b1_2d = self.b1.reshape(1, hid_dim)
        self.b2_2d = self.b2.reshape(1, interval_num)

    def __call__(self, x_in, t=None):
        surv_pred, feats = surv_head_forward(
            x_in, t, self.w1_io, self.b1_2d, self.w2_io, self.b2_2d)
        reg_weight = [self.w1, self.w2]                        # PyTorch (out, in)
        return surv_pred, reg_weight, feats


# ----------------------------------------------------------------------------
# Pure-JAX reference (for correctness check) + demo / smoke test
# ----------------------------------------------------------------------------
def _ref_forward(x_in, t, w1, b1, w2, b2):
    gaps = [jnp.mean(x.astype(jnp.float32), axis=(2, 3, 4)) for x in x_in]
    if t is not None:
        gaps.append(t.astype(jnp.float32))
    feats = jnp.concatenate(gaps, axis=1)
    h = jnp.maximum(feats @ w1.T + b1, 0.0)
    o = h @ w2.T + b2
    return jax.nn.sigmoid(o), feats


if __name__ == "__main__":
    key = jax.random.PRNGKey(0)
    k_params, k_x1, k_x2, k_x3, k_t = jax.random.split(key, 5)

    channel_num = 4
    interval_num = 10
    is_seg = False
    t_dim = 3
    B = 2

    # Pooled channels must sum to channel_num * 8 = 32.
    # First input has S=256 (strided landing path); the other two have S=32 and
    # S=8 (lane-dense landing + MXU segment-sum path).
    x_in = [
        jax.random.normal(k_x1, (B, 8, 4, 8, 8), jnp.float32),
        jax.random.normal(k_x2, (B, 8, 2, 4, 4), jnp.float32),
        jax.random.normal(k_x3, (B, 16, 2, 2, 2), jnp.float32),
    ]
    t = jax.random.normal(k_t, (B, t_dim), jnp.float32)

    head = SurvHeadPallas(channel_num, interval_num, is_seg, t_dim, k_params)
    surv_pred, reg_weight, feats = head(x_in, t)
    jax.block_until_ready(surv_pred)
    jax.block_until_ready(feats)

    assert surv_pred.shape == (B, interval_num)
    assert feats.shape == (B, channel_num * 8 + t_dim)

    ref_surv, ref_feats = _ref_forward(x_in, t, head.w1, head.b1, head.w2, head.b2)
    assert bool(jnp.allclose(feats, ref_feats, atol=1e-4, rtol=1e-4))
    assert bool(jnp.allclose(surv_pred, ref_surv, atol=1e-2, rtol=1e-2))
    assert bool(jnp.all((surv_pred >= 0.0) & (surv_pred <= 1.0)))

    print("KERNEL_OK")
</pallas_src>

<mosaic_0001>
module attributes {stable_mosaic.version = 11 : i64} {
  func.func @kernel(%arg0: memref<2x8x256xf32, #tpu.memory_space<any>>, %arg1: memref<2x256xf32, #tpu.memory_space<any>>, %arg2: memref<2x128xf32, #tpu.memory_space<any>>, %arg3: memref<2x3xf32, #tpu.memory_space<vmem>>, %arg4: memref<35x32xf32, #tpu.memory_space<vmem>>, %arg5: memref<1x32xf32, #tpu.memory_space<vmem>>, %arg6: memref<32x10xf32, #tpu.memory_space<vmem>>, %arg7: memref<1x10xf32, #tpu.memory_space<vmem>>, %arg8: memref<2x10xf32, #tpu.memory_space<vmem>>, %arg9: memref<2x35xf32, #tpu.memory_space<vmem>>, %arg10: memref<3x2x8x256xf32, #tpu.memory_space<vmem>>, %arg11: memref<3x2x256xf32, #tpu.memory_space<vmem>>, %arg12: memref<3x!tpu.dma_semaphore, #tpu.memory_space<semaphore_mem>>, %arg13: memref<2x128xf32, #tpu.memory_space<vmem>>) attributes {dimension_semantics = [], scalar_prefetch = 0 : i64, scratch_operands = 4 : i64, tpu.core_type = #tpu.core_type<tc>} {
    %cst = arith.constant 0.000000e+00 : f32
    %0 = vector.broadcast %cst : f32 to vector<2x128xf32>
    %c0 = arith.constant 0 : index
    %c0_0 = arith.constant 0 : index
    %1 = vector.load %arg13[%c0, %c0_0] : memref<2x128xf32, #tpu.memory_space<vmem>>, vector<2x128xf32>
    tpu.vector_store %arg13[%c0, %c0_0], %0 {strides = array<i32>} : memref<2x128xf32, #tpu.memory_space<vmem>>, vector<2x128xf32>,
    %c0_i32 = arith.constant 0 : i32
    %c0_i32_1 = arith.constant 0 : i32
    %c0_i32_2 = arith.constant 0 : i32
    %c0_i32_3 = arith.constant 0 : i32
    %c0_i32_4 = arith.constant 0 : i32
    %2 = tpu.memref_slice %arg0[%c0_i32_2, %c0_i32_3, %c0_i32_4] : memref<2x8x256xf32, #tpu.memory_space<any>> -> memref<2x8x256xf32, #tpu.memory_space<any>>
    %c0_i32_5 = arith.constant 0 : i32
    %c0_i32_6 = arith.constant 0 : i32
    %c0_i32_7 = arith.constant 0 : i32
    %3 = tpu.memref_slice %arg10[%c0_i32, %c0_i32_5, %c0_i32_6, %c0_i32_7] : memref<3x2x8x256xf32, #tpu.memory_space<vmem>> -> memref<1x2x8x256xf32, #tpu.memory_space<vmem>>
    %4 = tpu.memref_squeeze %3 : memref<1x2x8x256xf32, #tpu.memory_space<vmem>> -> memref<2x8x256xf32, #tpu.memory_space<vmem>>
    %5 = tpu.memref_slice %arg12[%c0_i32_1] : memref<3x!tpu.dma_semaphore, #tpu.memory_space<semaphore_mem>> -> memref<1x!tpu.dma_semaphore, #tpu.memory_space<semaphore_mem>>
    %6 = tpu.memref_squeeze %5 : memref<1x!tpu.dma_semaphore, #tpu.memory_space<semaphore_mem>> -> memref<!tpu.dma_semaphore, #tpu.memory_space<semaphore_mem>>
    tpu.enqueue_dma source(%2 : memref<2x8x256xf32, #tpu.memory_space<any>>) target(%4 : memref<2x8x256xf32, #tpu.memory_space<vmem>>) target_semaphore(%6 : memref<!tpu.dma_semaphore, #tpu.memory_space<semaphore_mem>>)
    %c1_i32 = arith.constant 1 : i32
    %c1_i32_8 = arith.constant 1 : i32
    %c0_i32_9 = arith.constant 0 : i32
    %c0_i32_10 = arith.constant 0 : i32
    %7 = tpu.memref_slice %arg1[%c0_i32_9, %c0_i32_10] : memref<2x256xf32, #tpu.memory_space<any>> -> memref<2x256xf32, #tpu.memory_space<any>>
    %c0_i32_11 = arith.constant 0 : i32
    %c0_i32_12 = arith.constant 0 : i32
    %8 = tpu.memref_slice %arg11[%c1_i32, %c0_i32_11, %c0_i32_12] : memref<3x2x256xf32, #tpu.memory_space<vmem>> -> memref<1x2x256xf32, #tpu.memory_space<vmem>>
    %9 = tpu.memref_squeeze %8 : memref<1x2x256xf32, #tpu.memory_space<vmem>> -> memref<2x256xf32, #tpu.memory_space<vmem>>
    %10 = tpu.memref_slice %arg12[%c1_i32_8] : memref<3x!tpu.dma_semaphore, #tpu.memory_space<semaphore_mem>> -> memref<1x!tpu.dma_semaphore, #tpu.memory_space<semaphore_mem>>
    %11 = tpu.memref_squeeze %10 : memref<1x!tpu.dma_semaphore, #tpu.memory_space<semaphore_mem>> -> memref<!tpu.dma_semaphore, #tpu.memory_space<semaphore_mem>>
    tpu.enqueue_dma source(%7 : memref<2x256xf32, #tpu.memory_space<any>>) target(%9 : memref<2x256xf32, #tpu.memory_space<vmem>>) target_semaphore(%11 : memref<!tpu.dma_semaphore, #tpu.memory_space<semaphore_mem>>)
    %c2_i32 = arith.constant 2 : i32
    %c2_i32_13 = arith.constant 2 : i32
    %c0_i32_14 = arith.constant 0 : i32
    %c0_i32_15 = arith.constant 0 : i32
    %12 = tpu.memref_slice %arg2[%c0_i32_14, %c0_i32_15] : memref<2x128xf32, #tpu.memory_space<any>> -> memref<2x128xf32, #tpu.memory_space<any>>
    %c0_i32_16 = arith.constant 0 : i32
    %c0_i32_17 = arith.constant 0 : i32
    %13 = tpu.memref_slice %arg11[%c2_i32, %c0_i32_16, %c0_i32_17] : memref<3x2x256xf32, #tpu.memory_space<vmem>> -> memref<1x2x128xf32, #tpu.memory_space<vmem>>
    %14 = tpu.memref_squeeze %13 : memref<1x2x128xf32, #tpu.memory_space<vmem>> -> memref<2x128xf32, #tpu.memory_space<vmem>>
    %15 = tpu.memref_slice %arg12[%c2_i32_13] : memref<3x!tpu.dma_semaphore, #tpu.memory_space<semaphore_mem>> -> memref<1x!tpu.dma_semaphore, #tpu.memory_space<semaphore_mem>>
    %16 = tpu.memref_squeeze %15 : memref<1x!tpu.dma_semaphore, #tpu.memory_space<semaphore_mem>> -> memref<!tpu.dma_semaphore, #tpu.memory_space<semaphore_mem>>
    tpu.enqueue_dma source(%12 : memref<2x128xf32, #tpu.memory_space<any>>) target(%14 : memref<2x128xf32, #tpu.memory_space<vmem>>) target_semaphore(%16 : memref<!tpu.dma_semaphore, #tpu.memory_space<semaphore_mem>>)
    %c0_i32_18 = arith.constant 0 : i32
    %c0_i32_19 = arith.constant 0 : i32
    %c0_i32_20 = arith.constant 0 : i32
    %c0_i32_21 = arith.constant 0 : i32
    %c0_i32_22 = arith.constant 0 : i32
    %17 = tpu.memref_slice %arg0[%c0_i32_20, %c0_i32_21, %c0_i32_22] : memref<2x8x256xf32, #tpu.memory_space<any>> -> memref<2x8x256xf32, #tpu.memory_space<any>>
    %c0_i32_23 = arith.constant 0 : i32
    %c0_i32_24 = arith.constant 0 : i32
    %c0_i32_25 = arith.constant 0 : i32
    %18 = tpu.memref_slice %arg10[%c0_i32_18, %c0_i32_23, %c0_i32_24, %c0_i32_25] : memref<3x2x8x256xf32, #tpu.memory_space<vmem>> -> memref<1x2x8x256xf32, #tpu.memory_space<vmem>>
    %19 = tpu.memref_squeeze %18 : memref<1x2x8x256xf32, #tpu.memory_space<vmem>> -> memref<2x8x256xf32, #tpu.memory_space<vmem>>
    %20 = tpu.memref_slice %arg12[%c0_i32_19] : memref<3x!tpu.dma_semaphore, #tpu.memory_space<semaphore_mem>> -> memref<1x!tpu.dma_semaphore, #tpu.memory_space<semaphore_mem>>
    %21 = tpu.memref_squeeze %20 : memref<1x!tpu.dma_semaphore, #tpu.memory_space<semaphore_mem>> -> memref<!tpu.dma_semaphore, #tpu.memory_space<semaphore_mem>>
    tpu.wait_dma2 semaphore(%21 : memref<!tpu.dma_semaphore, #tpu.memory_space<semaphore_mem>>) src(%17 : memref<2x8x256xf32, #tpu.memory_space<any>>) dst(%19 : memref<2x8x256xf32, #tpu.memory_space<vmem>>)
    %c0_26 = arith.constant 0 : index
    %c0_27 = arith.constant 0 : index
    %c0_28 = arith.constant 0 : index
    %c0_29 = arith.constant 0 : index
    %22 = vector.load %arg10[%c0_26, %c0_27, %c0_28, %c0_29] : memref<3x2x8x256xf32, #tpu.memory_space<vmem>>, vector<1x2x8x256xf32>
    %23 = vector.shape_cast %22 : vector<1x2x8x256xf32> to vector<2x8x256xf32>
    %cst_30 = arith.constant dense<0.000000e+00> : vector<2x8xf32>
    %24 = vector.multi_reduction <add>, %23, %cst_30 [2] : vector<2x8x256xf32> to vector<2x8xf32>
    %c0_31 = arith.constant 0 : index
    %c0_32 = arith.constant 0 : index
    %25 = vector.load %arg13[%c0_31, %c0_32] : memref<2x128xf32, #tpu.memory_space<vmem>>, vector<2x8xf32>
    %cst_33 = arith.constant 3.906250e-03 : f32
    %26 = vector.broadcast %cst_33 : f32 to vector<2x8xf32>
    %27 = arith.mulf %24, %26 : vector<2x8xf32>
    %28 = arith.addf %25, %27 : vector<2x8xf32>
    %c0_34 = arith.constant 0 : index
    %c0_35 = arith.constant 0 : index
    %29 = vector.load %arg13[%c0_34, %c0_35] : memref<2x128xf32, #tpu.memory_space<vmem>>, vector<2x8xf32>
    tpu.vector_store %arg13[%c0_34, %c0_35], %28 {strides = array<i32>} : memref<2x128xf32, #tpu.memory_space<vmem>>, vector<2x8xf32>,
    %c1_i32_36 = arith.constant 1 : i32
    %c1_i32_37 = arith.constant 1 : i32
    %c0_i32_38 = arith.constant 0 : i32
    %c0_i32_39 = arith.constant 0 : i32
    %30 = tpu.memref_slice %arg1[%c0_i32_38, %c0_i32_39] : memref<2x256xf32, #tpu.memory_space<any>> -> memref<2x256xf32, #tpu.memory_space<any>>
    %c0_i32_40 = arith.constant 0 : i32
    %c0_i32_41 = arith.constant 0 : i32
    %31 = tpu.memref_slice %arg11[%c1_i32_36, %c0_i32_40, %c0_i32_41] : memref<3x2x256xf32, #tpu.memory_space<vmem>> -> memref<1x2x256xf32, #tpu.memory_space<vmem>>
    %32 = tpu.memref_squeeze %31 : memref<1x2x256xf32, #tpu.memory_space<vmem>> -> memref<2x256xf32, #tpu.memory_space<vmem>>
    %33 = tpu.memref_slice %arg12[%c1_i32_37] : memref<3x!tpu.dma_semaphore, #tpu.memory_space<semaphore_mem>> -> memref<1x!tpu.dma_semaphore, #tpu.memory_space<semaphore_mem>>
    %34 = tpu.memref_squeeze %33 : memref<1x!tpu.dma_semaphore, #tpu.memory_space<semaphore_mem>> -> memref<!tpu.dma_semaphore, #tpu.memory_space<semaphore_mem>>
    tpu.wait_dma2 semaphore(%34 : memref<!tpu.dma_semaphore, #tpu.memory_space<semaphore_mem>>) src(%30 : memref<2x256xf32, #tpu.memory_space<any>>) dst(%32 : memref<2x256xf32, #tpu.memory_space<vmem>>)
    %c1 = arith.constant 1 : index
    %c0_42 = arith.constant 0 : index
    %c0_43 = arith.constant 0 : index
    %35 = vector.load %arg11[%c1, %c0_42, %c0_43] : memref<3x2x256xf32, #tpu.memory_space<vmem>>, vector<1x2x256xf32>
    %36 = vector.shape_cast %35 : vector<1x2x256xf32> to vector<2x256xf32>
    %37 = tpu.iota {dimensions = array<i32: 0>} : vector<256x8xi32>
    %38 = tpu.iota {dimensions = array<i32: 1>} : vector<256x8xi32>
    %c32_i32 = arith.constant 32 : i32
    %39 = vector.broadcast %c32_i32 : i32 to vector<256x8xi32>
    %40 = arith.muli %38, %39 : vector<256x8xi32>
    %41 = arith.cmpi sge, %37, %40 : vector<256x8xi32>
    %c32_i32_44 = arith.constant 32 : i32
    %42 = vector.broadcast %c32_i32_44 : i32 to vector<256x8xi32>
    %43 = arith.addi %40, %42 : vector<256x8xi32>
    %44 = arith.cmpi slt, %37, %43 : vector<256x8xi32>
    %45 = arith.andi %41, %44 : vector<256x8xi1>
    %cst_45 = arith.constant 1.000000e+00 : f32
    %cst_46 = arith.constant 0.000000e+00 : f32
    %46 = vector.broadcast %cst_45 : f32 to vector<256x8xf32>
    %47 = vector.broadcast %cst_46 : f32 to vector<256x8xf32>
    %48 = arith.select %45, %46, %47 : vector<256x8xi1>, vector<256x8xf32>
    %cst_47 = arith.constant dense<0.000000e+00> : vector<2x8xf32>
    %49 = tpu.matmul %36, %48, %cst_47 {dimension_numbers = #tpu.dot_dimension_numbers<[1], [0], [0], [1], [0, 0, 1, 1], [], []>} : vector<2x256xf32>, vector<256x8xf32>, vector<2x8xf32> -> vector<2x8xf32>
    %c0_48 = arith.constant 0 : index
    %c8 = arith.constant 8 : index
    %50 = vector.load %arg13[%c0_48, %c8] : memref<2x128xf32, #tpu.memory_space<vmem>>, vector<2x8xf32>
    %cst_49 = arith.constant 3.125000e-02 : f32
    %51 = vector.broadcast %cst_49 : f32 to vector<2x8xf32>
    %52 = arith.mulf %49, %51 : vector<2x8xf32>
    %53 = arith.addf %50, %52 : vector<2x8xf32>
    %c0_50 = arith.constant 0 : index
    %c8_51 = arith.constant 8 : index
    %54 = vector.load %arg13[%c0_50, %c8_51] : memref<2x128xf32, #tpu.memory_space<vmem>>, vector<2x8xf32>
    tpu.vector_store %arg13[%c0_50, %c8_51], %53 {strides = array<i32>} : memref<2x128xf32, #tpu.memory_space<vmem>>, vector<2x8xf32>,
    %c2_i32_52 = arith.constant 2 : i32
    %c2_i32_53 = arith.constant 2 : i32
    %c0_i32_54 = arith.constant 0 : i32
    %c0_i32_55 = arith.constant 0 : i32
    %55 = tpu.memref_slice %arg2[%c0_i32_54, %c0_i32_55] : memref<2x128xf32, #tpu.memory_space<any>> -> memref<2x128xf32, #tpu.memory_space<any>>
    %c0_i32_56 = arith.constant 0 : i32
    %c0_i32_57 = arith.constant 0 : i32
    %56 = tpu.memref_slice %arg11[%c2_i32_52, %c0_i32_56, %c0_i32_57] : memref<3x2x256xf32, #tpu.memory_space<vmem>> -> memref<1x2x128xf32, #tpu.memory_space<vmem>>
    %57 = tpu.memref_squeeze %56 : memref<1x2x128xf32, #tpu.memory_space<vmem>> -> memref<2x128xf32, #tpu.memory_space<vmem>>
    %58 = tpu.memref_slice %arg12[%c2_i32_53] : memref<3x!tpu.dma_semaphore, #tpu.memory_space<semaphore_mem>> -> memref<1x!tpu.dma_semaphore, #tpu.memory_space<semaphore_mem>>
    %59 = tpu.memref_squeeze %58 : memref<1x!tpu.dma_semaphore, #tpu.memory_space<semaphore_mem>> -> memref<!tpu.dma_semaphore, #tpu.memory_space<semaphore_mem>>
    tpu.wait_dma2 semaphore(%59 : memref<!tpu.dma_semaphore, #tpu.memory_space<semaphore_mem>>) src(%55 : memref<2x128xf32, #tpu.memory_space<any>>) dst(%57 : memref<2x128xf32, #tpu.memory_space<vmem>>)
    %c2 = arith.constant 2 : index
    %c0_58 = arith.constant 0 : index
    %c0_59 = arith.constant 0 : index
    %60 = vector.load %arg11[%c2, %c0_58, %c0_59] : memref<3x2x256xf32, #tpu.memory_space<vmem>>, vector<1x2x128xf32>
    %61 = vector.shape_cast %60 : vector<1x2x128xf32> to vector<2x128xf32>
    %62 = tpu.iota {dimensions = array<i32: 0>} : vector<128x16xi32>
    %63 = tpu.iota {dimensions = array<i32: 1>} : vector<128x16xi32>
    %c8_i32 = arith.constant 8 : i32
    %64 = vector.broadcast %c8_i32 : i32 to vector<128x16xi32>
    %65 = arith.muli %63, %64 : vector<128x16xi32>
    %66 = arith.cmpi sge, %62, %65 : vector<128x16xi32>
    %c8_i32_60 = arith.constant 8 : i32
    %67 = vector.broadcast %c8_i32_60 : i32 to vector<128x16xi32>
    %68 = arith.addi %65, %67 : vector<128x16xi32>
    %69 = arith.cmpi slt, %62, %68 : vector<128x16xi32>
    %70 = arith.andi %66, %69 : vector<128x16xi1>
    %cst_61 = arith.constant 1.000000e+00 : f32
    %cst_62 = arith.constant 0.000000e+00 : f32
    %71 = vector.broadcast %cst_61 : f32 to vector<128x16xf32>
    %72 = vector.broadcast %cst_62 : f32 to vector<128x16xf32>
    %73 = arith.select %70, %71, %72 : vector<128x16xi1>, vector<128x16xf32>
    %cst_63 = arith.constant dense<0.000000e+00> : vector<2x16xf32>
    %74 = tpu.matmul %61, %73, %cst_63 {dimension_numbers = #tpu.dot_dimension_numbers<[1], [0], [0], [1], [0, 0, 1, 1], [], []>} : vector<2x128xf32>, vector<128x16xf32>, vector<2x16xf32> -> vector<2x16xf32>
    %c0_64 = arith.constant 0 : index
    %c16 = arith.constant 16 : index
    %75 = vector.load %arg13[%c0_64, %c16] : memref<2x128xf32, #tpu.memory_space<vmem>>, vector<2x16xf32>
    %cst_65 = arith.constant 1.250000e-01 : f32
    %76 = vector.broadcast %cst_65 : f32 to vector<2x16xf32>
    %77 = arith.mulf %74, %76 : vector<2x16xf32>
    %78 = arith.addf %75, %77 : vector<2x16xf32>
    %c0_66 = arith.constant 0 : index
    %c16_67 = arith.constant 16 : index
    %79 = vector.load %arg13[%c0_66, %c16_67] : memref<2x128xf32, #tpu.memory_space<vmem>>, vector<2x16xf32>
    tpu.vector_store %arg13[%c0_66, %c16_67], %78 {strides = array<i32>} : memref<2x128xf32, #tpu.memory_space<vmem>>, vector<2x16xf32>,
    %c0_68 = arith.constant 0 : index
    %c0_69 = arith.constant 0 : index
    %80 = vector.load %arg3[%c0_68, %c0_69] : memref<2x3xf32, #tpu.memory_space<vmem>>, vector<2x3xf32>
    %c0_70 = arith.constant 0 : index
    %c32 = arith.constant 32 : index
    %81 = vector.load %arg13[%c0_70, %c32] : memref<2x128xf32, #tpu.memory_space<vmem>>, vector<2x3xf32>
    tpu.vector_store %arg13[%c0_70, %c32], %80 {strides = array<i32>} : memref<2x128xf32, #tpu.memory_space<vmem>>, vector<2x3xf32>,
    %c0_71 = arith.constant 0 : index
    %c0_72 = arith.constant 0 : index
    %82 = vector.load %arg13[%c0_71, %c0_72] : memref<2x128xf32, #tpu.memory_space<vmem>>, vector<2x35xf32>
    %c0_73 = arith.constant 0 : index
    %c0_74 = arith.constant 0 : index
    %83 = vector.load %arg9[%c0_73, %c0_74] : memref<2x35xf32, #tpu.memory_space<vmem>>, vector<2x35xf32>
    tpu.vector_store %arg9[%c0_73, %c0_74], %82 {strides = array<i32>} : memref<2x35xf32, #tpu.memory_space<vmem>>, vector<2x35xf32>,
    %c0_75 = arith.constant 0 : index
    %c0_76 = arith.constant 0 : index
    %84 = vector.load %arg4[%c0_75, %c0_76] : memref<35x32xf32, #tpu.memory_space<vmem>>, vector<35x32xf32>
    %cst_77 = arith.constant dense<0.000000e+00> : vector<2x32xf32>
    %85 = tpu.matmul %82, %84, %cst_77 {dimension_numbers = #tpu.dot_dimension_numbers<[1], [0], [0], [1], [0, 0, 1, 1], [], []>} : vector<2x35xf32>, vector<35x32xf32>, vector<2x32xf32> -> vector<2x32xf32>
    %c0_78 = arith.constant 0 : index
    %c0_79 = arith.constant 0 : index
    %86 = vector.load %arg5[%c0_78, %c0_79] : memref<1x32xf32, #tpu.memory_space<vmem>>, vector<1x32xf32>
    %87 = vector.broadcast %86 : vector<1x32xf32> to vector<2x32xf32>
    %88 = arith.addf %85, %87 : vector<2x32xf32>
    %cst_80 = arith.constant 0.000000e+00 : f32
    %89 = vector.broadcast %cst_80 : f32 to vector<2x32xf32>
    %90 = arith.maximumf %88, %89 : vector<2x32xf32>
    %c0_81 = arith.constant 0 : index
    %c0_82 = arith.constant 0 : index
    %91 = vector.load %arg6[%c0_81, %c0_82] : memref<32x10xf32, #tpu.memory_space<vmem>>, vector<32x10xf32>
    %cst_83 = arith.constant dense<0.000000e+00> : vector<2x10xf32>
    %92 = tpu.matmul %90, %91, %cst_83 {dimension_numbers = #tpu.dot_dimension_numbers<[1], [0], [0], [1], [0, 0, 1, 1], [], []>} : vector<2x32xf32>, vector<32x10xf32>, vector<2x10xf32> -> vector<2x10xf32>
    %c0_84 = arith.constant 0 : index
    %c0_85 = arith.constant 0 : index
    %93 = vector.load %arg7[%c0_84, %c0_85] : memref<1x10xf32, #tpu.memory_space<vmem>>, vector<1x10xf32>
    %94 = vector.broadcast %93 : vector<1x10xf32> to vector<2x10xf32>
    %95 = arith.addf %92, %94 : vector<2x10xf32>
    %96 = math.absf %95 : vector<2x10xf32>
    %cst_86 = arith.constant 0.000000e+00 : f32
    %97 = vector.broadcast %cst_86 : f32 to vector<2x10xf32>
    %98 = arith.subf %97, %96 : vector<2x10xf32>
    %99 = math.exp %98 : vector<2x10xf32>
    %cst_87 = arith.constant 1.000000e+00 : f32
    %100 = vector.broadcast %cst_87 : f32 to vector<2x10xf32>
    %101 = arith.addf %100, %99 : vector<2x10xf32>
    %cst_88 = arith.constant 1.000000e+00 : f32
    %102 = vector.broadcast %cst_88 : f32 to vector<2x10xf32>
    %103 = arith.divf %102, %101 : vector<2x10xf32>
    %cst_89 = arith.constant 0.000000e+00 : f32
    %104 = vector.broadcast %cst_89 : f32 to vector<2x10xf32>
    %105 = arith.cmpf oge, %95, %104 : vector<2x10xf32>
    %cst_90 = arith.constant 1.000000e+00 : f32
    %106 = vector.broadcast %cst_90 : f32 to vector<2x10xf32>
    %107 = arith.subf %106, %103 : vector<2x10xf32>
    %108 = arith.select %105, %103, %107 : vector<2x10xi1>, vector<2x10xf32>
    %c0_91 = arith.constant 0 : index
    %c0_92 = arith.constant 0 : index
    %109 = vector.load %arg8[%c0_91, %c0_92] : memref<2x10xf32, #tpu.memory_space<vmem>>, vector<2x10xf32>
    tpu.vector_store %arg8[%c0_91, %c0_92], %108 {strides = array<i32>} : memref<2x10xf32, #tpu.memory_space<vmem>>, vector<2x10xf32>,
    return
  }
}

</mosaic_0001>

<bundles_post_ra>
// kernel: tpu_custom_call.1
= control target key start
LH: loop header
LB: loop body
LE: loop exit
PB: predicated region body
PF: predicated region fallthrough
CT: control target
= control target key end

     0   :  { %15 = vsyncpa [#allocation7], 0  ;;  %s1602_s0 = inlined_call_operand.vmem [shape: f32[2,8,256], index: 0, kind: input, shape index: {}]   ;;  %s1603_s1 = inlined_call_operand.vmem [shape: f32[2,256], index: 1, kind: input, shape index: {}]   ;;  %s1604_s2 = inlined_call_operand.vmem [shape: f32[2,128], index: 2, kind: input, shape index: {}]   ;;  %s1605_s3 = inlined_call_operand.vmem [shape: f32[2,3], index: 3, kind: input, shape index: {}]   ;;  %s1606_s4 = inlined_call_operand.vmem [shape: f32[35,32], index: 4, kind: input, shape index: {}]   ;;  %s1607_s5 = inlined_call_operand.vmem [shape: f32[1,32], index: 5, kind: input, shape index: {}]   ;;  %s1608_s6 = inlined_call_operand.vmem [shape: f32[32,10], index: 6, kind: input, shape index: {}]   ;;  %s1609_s7 = inlined_call_operand.vmem [shape: f32[1,10], index: 7, kind: input, shape index: {}]   ;;  %s1610_s8 = inlined_call_operand.hbm [shape: f32[2,10], index: 8, kind: output, shape index: {0}]   ;;  %s1611_s9 = inlined_call_operand.hbm [shape: f32[2,35], index: 9, kind: output, shape index: {1}]  }
   0x1   :  { %16 = vsyncpa [#allocation9], 0  ;;  %v61_v0 = vld [vmem:[%s1602_s0] sm:$0xff]  ;;  %v63_v1 = vld [vmem:[%s1602_s0 + $0x8] sm:$0xff]  ;;  %v1133_v2 = vmov 0.0  }
   0x2   :  { %27 = vst [vmem:[#allocation5] sm:$0x3] %v1133_v2  ;;  %v65_v3 = vld [vmem:[%s1602_s0 + $0x10] sm:$0xff]  ;;  %v67_v4 = vld [vmem:[%s1602_s0 + $0x18] sm:$0xff] }
   0x3   :  { %76 = vsyncadd [#allocation4], 512  ;;  %v97_v5 = vld [vmem:[%s1603_s1] sm:$0xf] }
   0x4   :  { %98 = vst [vmem:[#allocation3 + $0x4] sm:$0xf] %v97_v5 }
   0x5   :  { %124 = vsyncadd [#allocation4 + $0x1], 64  ;;  %v145_v6 = vld [vmem:[%s1604_s2] sm:$0x3] }
   0x6   :  { %146 = vst [vmem:[#allocation3 + $0x8] sm:$0x3] %v145_v6 }
   0x7   :  { %172 = vsyncadd [#allocation4 + $0x2], 32  ;;  %v182_v7 = vadd.f32 %v63_v1, %v61_v0 }
   0x8   :  { %1123 = dma.done.wait [#allocation4], 512 }
   0x9   :  { %1124 = vsyncadd [#allocation4], 4294966784  ;;  %183 = vadd.xlane.f32.xlu0 %v182_v7  ;;  %v185_v8 = vadd.f32 %v67_v4, %v65_v3  ;;  %v193_v9 = vlaneseq  ;;  %vm203_vm0 = vcmask 1041409   ;;  %v188_v18 = vld [vmem:[#allocation5] sm:$0x3]  ;;  %vm207_vm1 = vcmask 58368  }
   0xb   :  { %v1210_v10 = vand.u32 127, %v193_v9  ;;  %v1212_v11 = vshrl.u32 %v193_v9, 7 }
   0xd   :  { %186 = vadd.xlane.f32.xlu0 %v185_v8  ;;  %v197_v13 = vsub.s32 %v1210_v10, %v1212_v11  ;;  %v246_v22 = vadd.s32 248, %v1212_v11  ;;  %v1218_v23 = vmul.u32 32, %v1210_v10  ;;  %v1221_v24 = vadd.s32 120, %v1212_v11 }
  0x92   :  { %v184_v12 = vpop.xlane.xlu0 %183 }
  0x93   :  { %v189_v14 = vmul.f32 0.00390625, %v184_v12 }
  0x95   :  { %v198_v17 = vrot.slane %v189_v14, %v197_v13 }
  0x96   :  { %v187_v15 = vpop.xlane.xlu0 %186 }
  0x97   :  { %v190_v16 = vmul.f32 0.00390625, %v187_v15 }
  0x99   :  { %v202_v19 = vrot.slane %v190_v16, %v197_v13 }
  0x9b   :  { %v204_v20 = vsel %vm203_vm0, %v202_v19, %v198_v17 }
  0x9c   :  { %v206_v21 = vadd.f32 %v204_v20, %v188_v18 }
  0x9e   :  { %208 = vst.msk [vmem:[#allocation5] sm:$0x3] %vm207_vm1, %v206_v21 }
  0x9f   :  { %1125 = dma.done.wait [#allocation4 + $0x1], 64 }
  0xa0   :  { %1126 = vsyncadd [#allocation4 + $0x1], 4294967232  ;;  %v245_v25 = vadd.s32 240, %v1212_v11  ;;  %v1225_v26 = vadd.s32 112, %v1212_v11  ;;  %vm279_vm2 = vcmp.ge.s32.totalorder %v246_v22, %v1218_v23  ;;  %v1229_v27 = vadd.s32 32, %v1218_v23  ;;  %s1135_s0 = smov 8   ;;  %1012 = vmatprep.subr.mxu1 %v1133_v2 }
  0xa1   :  { %v244_v28 = vadd.s32 232, %v1212_v11  ;;  %vm263_vm3 = vcmp.ge.s32.totalorder %v1221_v24, %v1218_v23  ;;  %v1235_v29 = vadd.s32 104, %v1212_v11  ;;  %v243_v30 = vadd.s32 224, %v1212_v11 }
  0xa2   :  { %vm312_vm4 = vcmp.lt.s32.totalorder %v246_v22, %v1229_v27  ;;  %vm296_vm5 = vcmp.lt.s32.totalorder %v1221_v24, %v1229_v27  ;;  %vm278_vm6 = vcmp.ge.s32.totalorder %v245_v25, %v1218_v23  ;;  %vm311_vm7 = vcmp.lt.s32.totalorder %v245_v25, %v1229_v27  ;;  %v1351_v49 = vld.sshfl [vmem:[#allocation3 + $0x4] sm:$0x33 pattern:$0x76325410] }
  0xa3   :  { %vm344_vm8 = vmand %vm279_vm2, %vm312_vm4  ;;  %vm262_vm9 = vcmp.ge.s32.totalorder %v1225_v26, %v1218_v23  ;;  %vm295_vm10 = vcmp.lt.s32.totalorder %v1225_v26, %v1229_v27  ;;  %v1134_v31 = vmov 1.0   ;;  %vm277_vm12 = vcmp.ge.s32.totalorder %v244_v28, %v1218_v23 }
  0xa4   :  { %949 = vmatprep.subr.msk.mxu0 %vm344_vm8, %v1134_v31  ;;  %vm328_vm11 = vmand %vm263_vm3, %vm296_vm5  ;;  %vm310_vm13 = vcmp.lt.s32.totalorder %v244_v28, %v1229_v27  ;;  %v1251_v32 = vadd.s32 96, %v1212_v11  ;;  %v242_v33 = vadd.s32 216, %v1212_v11  ;;  %vm261_vm15 = vcmp.ge.s32.totalorder %v1235_v29, %v1218_v23 }
  0xa5   :  { %950 = vmatpush3.msk.msra.mxu0 %vm328_vm11, %v1134_v31  ;;  %vm343_vm14 = vmand %vm278_vm6, %vm311_vm7  ;;  %vm294_vm0 = vcmp.lt.s32.totalorder %v1235_v29, %v1229_v27  ;;  %v1260_v34 = vadd.s32 88, %v1212_v11  ;;  %vm276_vm2 = vcmp.ge.s32.totalorder %v243_v30, %v1218_v23  ;;  %vm309_vm3 = vcmp.lt.s32.totalorder %v243_v30, %v1229_v27  ;;  %v458_v62 = vld [vmem:[#allocation5] sm:$0x3] }
  0xa6   :  { %951 = vmatprep.subr.msk.mxu0 %vm343_vm14, %v1134_v31  ;;  %vm327_vm1 = vmand %vm262_vm9, %vm295_vm10  ;;  %v241_v35 = vadd.s32 208, %v1212_v11  ;;  %vm260_vm5 = vcmp.ge.s32.totalorder %v1251_v32, %v1218_v23  ;;  %vm293_vm6 = vcmp.lt.s32.totalorder %v1251_v32, %v1229_v27  ;;  %v1277_v36 = vadd.s32 80, %v1212_v11 }
  0xa7   :  { %952 = vmatpush3.msk.msra.mxu0 %vm327_vm1, %v1134_v31  ;;  %vm342_vm4 = vmand %vm277_vm12, %vm310_vm13  ;;  %vm275_vm8 = vcmp.ge.s32.totalorder %v242_v33, %v1218_v23  ;;  %vm308_vm9 = vcmp.lt.s32.totalorder %v242_v33, %v1229_v27  ;;  %v240_v37 = vadd.s32 200, %v1212_v11  ;;  %vm259_vm11 = vcmp.ge.s32.totalorder %v1260_v34, %v1218_v23 }
  0xa8   :  { %953 = vmatprep.subr.msk.mxu0 %vm342_vm4, %v1134_v31  ;;  %vm326_vm7 = vmand %vm261_vm15, %vm294_vm0  ;;  %vm292_vm12 = vcmp.lt.s32.totalorder %v1260_v34, %v1229_v27  ;;  %v1289_v38 = vadd.s32 72, %v1212_v11  ;;  %vm274_vm14 = vcmp.ge.s32.totalorder %v241_v35, %v1218_v23  ;;  %vm307_vm15 = vcmp.lt.s32.totalorder %v241_v35, %v1229_v27 }
  0xa9   :  { %954 = vmatpush3.msk.msra.mxu0 %vm326_vm7, %v1134_v31  ;;  %vm341_vm10 = vmand %vm276_vm2, %vm309_vm3  ;;  %v239_v39 = vadd.s32 192, %v1212_v11  ;;  %vm258_vm1 = vcmp.ge.s32.totalorder %v1277_v36, %v1218_v23  ;;  %vm291_vm2 = vcmp.lt.s32.totalorder %v1277_v36, %v1229_v27  ;;  %v1301_v40 = vadd.s32 64, %v1212_v11 }
  0xaa   :  { %955 = vmatprep.subr.msk.mxu0 %vm341_vm10, %v1134_v31  ;;  %vm325_vm13 = vmand %vm260_vm5, %vm293_vm6  ;;  %vm273_vm4 = vcmp.ge.s32.totalorder %v240_v37, %v1218_v23  ;;  %vm306_vm5 = vcmp.lt.s32.totalorder %v240_v37, %v1229_v27  ;;  %v238_v41 = vadd.s32 184, %v1212_v11  ;;  %vm257_vm7 = vcmp.ge.s32.totalorder %v1289_v38, %v1218_v23 }
  0xab   :  { %956 = vmatpush3.msk.msra.mxu0 %vm325_vm13, %v1134_v31  ;;  %vm340_vm0 = vmand %vm275_vm8, %vm308_vm9  ;;  %vm290_vm8 = vcmp.lt.s32.totalorder %v1289_v38, %v1229_v27  ;;  %v1313_v42 = vadd.s32 56, %v1212_v11  ;;  %vm272_vm10 = vcmp.ge.s32.totalorder %v239_v39, %v1218_v23  ;;  %v237_v43 = vadd.s32 176, %v1212_v11 }
  0xac   :  { %957 = vmatprep.subr.msk.mxu0 %vm340_vm0, %v1134_v31  ;;  %vm324_vm3 = vmand %vm259_vm11, %vm292_vm12  ;;  %vm305_vm11 = vcmp.lt.s32.totalorder %v239_v39, %v1229_v27  ;;  %vm256_vm13 = vcmp.ge.s32.totalorder %v1301_v40, %v1218_v23  ;;  %v1325_v44 = vadd.s32 48, %v1212_v11  ;;  %vm271_vm0 = vcmp.ge.s32.totalorder %v238_v41, %v1218_v23 }
  0xad   :  { %958 = vmatpush3.msk.msra.mxu0 %vm324_vm3, %v1134_v31  ;;  %vm339_vm6 = vmand %vm274_vm14, %vm307_vm15  ;;  %vm289_vm14 = vcmp.lt.s32.totalorder %v1301_v40, %v1229_v27  ;;  %v236_v45 = vadd.s32 168, %v1212_v11  ;;  %vm255_vm3 = vcmp.ge.s32.totalorder %v1313_v42, %v1218_v23  ;;  %v1337_v46 = vadd.s32 40, %v1212_v11 }
  0xae   :  { %959 = vmatprep.subr.msk.mxu0 %vm339_vm6, %v1134_v31  ;;  %vm323_vm9 = vmand %vm258_vm1, %vm291_vm2  ;;  %vm304_vm1 = vcmp.lt.s32.totalorder %v238_v41, %v1229_v27  ;;  %vm270_vm6 = vcmp.ge.s32.totalorder %v237_v43, %v1218_v23  ;;  %v235_v47 = vadd.s32 160, %v1212_v11  ;;  %v1349_v48 = vadd.s32 32, %v1212_v11 }
  0xaf   :  { %960 = vmatpush3.msk.msra.mxu0 %vm323_vm9, %v1134_v31  ;;  %vm338_vm12 = vmand %vm273_vm4, %vm306_vm5  ;;  %vm288_vm4 = vcmp.lt.s32.totalorder %v1313_v42, %v1229_v27  ;;  %vm254_vm9 = vcmp.ge.s32.totalorder %v1325_v44, %v1218_v23  ;;  %v234_v50 = vadd.s32 152, %v1212_v11  ;;  %v1368_v51 = vadd.s32 24, %v1212_v11 }
  0xb0   :  { %961 = vmatprep.subr.msk.mxu0 %vm338_vm12, %v1134_v31  ;;  %vm322_vm15 = vmand %vm257_vm7, %vm290_vm8  ;;  %vm303_vm7 = vcmp.lt.s32.totalorder %v237_v43, %v1229_v27  ;;  %vm269_vm12 = vcmp.ge.s32.totalorder %v236_v45, %v1218_v23  ;;  %v233_v52 = vadd.s32 144, %v1212_v11  ;;  %v385_v53 = vcombine.high %v1351_v49, %v1351_v49 }
  0xb1   :  { %962 = vmatpush3.msk.msra.mxu0 %vm322_vm15, %v1134_v31  ;;  %vm337_vm2 = vmand %vm272_vm10, %vm305_vm11  ;;  %vm287_vm10 = vcmp.lt.s32.totalorder %v1325_v44, %v1229_v27  ;;  %vm253_vm15 = vcmp.ge.s32.totalorder %v1337_v46, %v1218_v23  ;;  %v1387_v54 = vadd.s32 16, %v1212_v11  ;;  %v232_v55 = vadd.s32 136, %v1212_v11 }
  0xb2   :  { %963 = vmatprep.subr.msk.mxu0 %vm337_vm2, %v1134_v31  ;;  %vm321_vm5 = vmand %vm256_vm13, %vm289_vm14  ;;  %vm302_vm13 = vcmp.lt.s32.totalorder %v236_v45, %v1229_v27  ;;  %vm268_vm2 = vcmp.ge.s32.totalorder %v235_v47, %v1218_v23  ;;  %452 = vmatprep.mubr.f32.mxu0 %v385_v53  ;;  %v1406_v56 = vadd.s32 8, %v1212_v11  ;;  %v231_v57 = vadd.s32 128, %v1212_v11 }
  0xb3   :  { %964 = vmatpush3.msk.msra.mxu0 %vm321_vm5, %v1134_v31  ;;  %vm336_vm8 = vmand %vm271_vm0, %vm304_vm1  ;;  %vm286_vm0 = vcmp.lt.s32.totalorder %v1337_v46, %v1229_v27  ;;  %vm252_vm5 = vcmp.ge.s32.totalorder %v1349_v48, %v1218_v23  ;;  %v1445_v1 = vmul.u32 8, %v1210_v10 }
  0xb4   :  { %965 = vmatprep.subr.msk.mxu0 %vm336_vm8, %v1134_v31  ;;  %vm320_vm11 = vmand %vm255_vm3, %vm288_vm4  ;;  %vm301_vm3 = vcmp.lt.s32.totalorder %v235_v47, %v1229_v27  ;;  %vm267_vm8 = vcmp.ge.s32.totalorder %v234_v50, %v1218_v23 }
  0xb5   :  { %966 = vmatpush3.msk.msra.mxu0 %vm320_vm11, %v1134_v31  ;;  %vm335_vm14 = vmand %vm270_vm6, %vm303_vm7  ;;  %vm285_vm6 = vcmp.lt.s32.totalorder %v1349_v48, %v1229_v27  ;;  %vm251_vm11 = vcmp.ge.s32.totalorder %v1368_v51, %v1218_v23 }
  0xb6   :  { %967 = vmatprep.subr.msk.mxu0 %vm335_vm14, %v1134_v31  ;;  %vm319_vm1 = vmand %vm254_vm9, %vm287_vm10  ;;  %vm300_vm9 = vcmp.lt.s32.totalorder %v234_v50, %v1229_v27  ;;  %vm266_vm14 = vcmp.ge.s32.totalorder %v233_v52, %v1218_v23 }
  0xb7   :  { %968 = vmatpush3.msk.msra.mxu0 %vm319_vm1, %v1134_v31  ;;  %vm334_vm4 = vmand %vm269_vm12, %vm302_vm13  ;;  %vm284_vm12 = vcmp.lt.s32.totalorder %v1368_v51, %v1229_v27  ;;  %vm250_vm1 = vcmp.ge.s32.totalorder %v1387_v54, %v1218_v23 }
  0xb8   :  { %969 = vmatprep.subr.msk.mxu0 %vm334_vm4, %v1134_v31  ;;  %vm318_vm7 = vmand %vm253_vm15, %vm286_vm0  ;;  %vm299_vm15 = vcmp.lt.s32.totalorder %v233_v52, %v1229_v27  ;;  %vm265_vm4 = vcmp.ge.s32.totalorder %v232_v55, %v1218_v23 }
  0xb9   :  { %970 = vmatpush3.msk.msra.mxu0 %vm318_vm7, %v1134_v31  ;;  %vm333_vm10 = vmand %vm268_vm2, %vm301_vm3  ;;  %vm283_vm2 = vcmp.lt.s32.totalorder %v1387_v54, %v1229_v27  ;;  %vm249_vm7 = vcmp.ge.s32.totalorder %v1406_v56, %v1218_v23 }
  0xba   :  { %971 = vmatprep.subr.msk.mxu0 %vm333_vm10, %v1134_v31  ;;  %vm317_vm13 = vmand %vm252_vm5, %vm285_vm6  ;;  %vm298_vm5 = vcmp.lt.s32.totalorder %v232_v55, %v1229_v27  ;;  %vm264_vm10 = vcmp.ge.s32.totalorder %v231_v57, %v1218_v23 }
  0xbb   :  { %972 = vmatpush3.msk.msra.mxu0 %vm317_vm13, %v1134_v31  ;;  %vm332_vm0 = vmand %vm267_vm8, %vm300_vm9  ;;  %vm282_vm8 = vcmp.lt.s32.totalorder %v1406_v56, %v1229_v27  ;;  %vm248_vm13 = vcmp.ge.s32.totalorder %v1212_v11, %v1218_v23 }
  0xbc   :  { %973 = vmatprep.subr.msk.mxu0 %vm332_vm0, %v1134_v31  ;;  %vm316_vm3 = vmand %vm251_vm11, %vm284_vm12  ;;  %vm297_vm11 = vcmp.lt.s32.totalorder %v231_v57, %v1229_v27 }
  0xbd   :  { %974 = vmatpush3.msk.msra.mxu0 %vm316_vm3, %v1134_v31  ;;  %vm331_vm6 = vmand %vm266_vm14, %vm299_vm15  ;;  %vm281_vm14 = vcmp.lt.s32.totalorder %v1212_v11, %v1229_v27 }
  0xbe   :  { %975 = vmatprep.subr.msk.mxu0 %vm331_vm6, %v1134_v31  ;;  %vm315_vm9 = vmand %vm250_vm1, %vm283_vm2  ;;  %vm465_vm2 = vcmask 123968  }
  0xbf   :  { %976 = vmatpush3.msk.msra.mxu0 %vm315_vm9, %v1134_v31  ;;  %vm330_vm12 = vmand %vm265_vm4, %vm298_vm5 }
  0xc0   :  { %977 = vmatprep.subr.msk.mxu0 %vm330_vm12, %v1134_v31  ;;  %vm314_vm15 = vmand %vm249_vm7, %vm282_vm8 }
  0xc1   :  { %978 = vmatpush3.msk.msra.mxu0 %vm314_vm15, %v1134_v31  ;;  %vm329_vm0 = vmand %vm264_vm10, %vm297_vm11 }
  0xc2   :  { %979 = vmatprep.subr.msk.mxu0 %vm329_vm0, %v1134_v31  ;;  %vm313_vm1 = vmand %vm248_vm13, %vm281_vm14 }
  0xc3   :  { %980 = vmatpush3.msk.msra.mxu0 %vm313_vm1, %v1134_v31 }
  0xc4   :  { %453 = vmatmul.mubr.f32.vlgmr.msra.gmra.mxu0 %v1351_v49 }
 0x184   :  { %v981_v58 = vpop.f32.mrf.mxu0 }
 0x186   :  { %v982_v59 = vpop.f32.mrf.mxu0 }
 0x187   :  { %v983_v60 = vadd.f32 %v982_v59, %v981_v58 }
 0x189   :  { %v459_v61 = vmul.f32 0.03125, %v983_v60 }
 0x18b   :  { %461 = vrot.lane.b32.xlu0 %v459_v61, %s1135_s0 }
 0x1fd   :  { %v462_v63 = vpop.permute.xlu0 %461 }
 0x1fe   :  { %v464_v0 = vadd.f32 %v462_v63, %v458_v62 }
 0x200   :  { %466 = vst.msk [vmem:[#allocation5] sm:$0x3] %vm465_vm2, %v464_v0 }
 0x201   :  { %1127 = dma.done.wait [#allocation4 + $0x2], 32 }
 0x202   :  { %1128 = vsyncadd [#allocation4 + $0x2], 4294967264  ;;  %1047 = vmatprep.subr.mxu0 %v1133_v2  ;;  %vm1136_vm3 = vmmov 0   ;;  %vm487_vm4 = vcmp.ge.s32.totalorder %v1221_v24, %v1445_v1  ;;  %v1455_v3 = vadd.s32 8, %v1445_v1  ;;  %vm486_vm5 = vcmp.ge.s32.totalorder %v1225_v26, %v1445_v1  ;;  %v470_v4 = vld [vmem:[#allocation3 + $0x8] sm:$0x3] }
 0x203   :  { %1044 = vmatprep.mubr.msk.f32.mxu1 %vm1136_vm3, %v1133_v2  ;;  %1057 = vmatprep.mubr.msk.f32.mxu0 %vm1136_vm3, %v1133_v2  ;;  %vm485_vm8 = vcmp.ge.s32.totalorder %v1235_v29, %v1445_v1  ;;  %vm484_vm12 = vcmp.ge.s32.totalorder %v1251_v32, %v1445_v1  ;;  %vm483_vm15 = vcmp.ge.s32.totalorder %v1260_v34, %v1445_v1  ;;  %v630_v5 = vld [vmem:[%s1606_s4 + $0x20] sm:$0x7]  ;;  %v629_v6 = vld [vmem:[%s1606_s4 + $0x18] sm:$0xff]  ;;  %v628_v7 = vld [vmem:[%s1606_s4 + $0x10] sm:$0xff]  ;;  %s1137_s10 = smov 16   ;;  %s1139_s20 = smov [#allocation8]  }
 0x204   :  { %vm504_vm6 = vcmp.lt.s32.totalorder %v1221_v24, %v1455_v3  ;;  %vm503_vm7 = vcmp.lt.s32.totalorder %v1225_v26, %v1455_v3  ;;  %vm502_vm9 = vcmp.lt.s32.totalorder %v1235_v29, %v1455_v3  ;;  %vm501_vm13 = vcmp.lt.s32.totalorder %v1251_v32, %v1455_v3  ;;  %v627_v8 = vld [vmem:[%s1606_s4 + $0x8] sm:$0xff]  ;;  %v626_v9 = vld [vmem:[%s1606_s4] sm:$0xff]  ;;  %v720_v13 = vld [vmem:[%s1608_s6 + $0x18] sm:$0xff]  ;;  %s1138_s4 = smov 32   ;;  %s830_s0 = sshll.u32 %s1139_s20, 4  ;;  %s831_s0 = int_to_ptr.vmem [resolvable:$true] %s830_s0 }
 0x205   :  { %vm520_vm10 = vmand %vm487_vm4, %vm504_vm6  ;;  %vm500_vm0 = vcmp.lt.s32.totalorder %v1260_v34, %v1455_v3  ;;  %vm482_vm2 = vcmp.ge.s32.totalorder %v1277_v36, %v1445_v1  ;;  %vm499_vm4 = vcmp.lt.s32.totalorder %v1277_v36, %v1455_v3  ;;  %vm481_vm6 = vcmp.ge.s32.totalorder %v1289_v38, %v1445_v1  ;;  %v616_v14 = vld [vmem:[%s1605_s3] sm:$0x3]  ;;  %v719_v20 = vld [vmem:[%s1608_s6 + $0x10] sm:$0xff]  ;;  %s1083_s1 = scalar_lea.vmem %s831_s0, 32  ;;  %p1088_p1 = scmp.lt.s32.totalorder %s831_s0, %s831_s0 }
 0x206   :  { %1013 = vmatpush3.msk.msra.mxu1 %vm520_vm10, %v1134_v31  ;;  %vm519_vm11 = vmand %vm486_vm5, %vm503_vm7  ;;  %vm498_vm7 = vcmp.lt.s32.totalorder %v1289_v38, %v1455_v3  ;;  %vm497_vm10 = vcmp.lt.s32.totalorder %v1301_v40, %v1455_v3  ;;  %v718_v21 = vld [vmem:[%s1608_s6 + $0x8] sm:$0xff]  ;;  %v717_v22 = vld [vmem:[%s1608_s6] sm:$0xff]  ;;  %p1084_p0 = scmp.ne.s32.totalorder %s831_s0, %s1083_s1  ;;  %p1089_p2 = scmp.lt.s32.totalorder %s1083_s1, %s1083_s1 }
 0x207   :  { %1014 = vmatprep.subr.mxu1 %v1133_v2  ;;  %vm518_vm14 = vmand %vm485_vm8, %vm502_vm9  ;;  %vm480_vm9 = vcmp.ge.s32.totalorder %v1301_v40, %v1445_v1  ;;  %v607_v15 = vld [vmem:[#allocation5] sm:$0x3]  ;;  %v941_v23 = vld [vmem:[%s1607_s5] ss:$0 sm:$0xff] }
 0x208   :  { %1015 = vmatpush3.msk.msra.mxu1 %vm519_vm11, %v1134_v31  ;;  %vm517_vm1 = vmand %vm484_vm12, %vm501_vm13  ;;  %vm479_vm12 = vcmp.ge.s32.totalorder %v1313_v42, %v1445_v1  ;;  %vm496_vm13 = vcmp.lt.s32.totalorder %v1313_v42, %v1455_v3  ;;  %p1090_p3 = por %p1089_p2, %p1088_p1 }
 0x209   :  { %1016 = vmatprep.subr.mxu1 %v1133_v2  ;;  %vm516_vm5 = vmand %vm483_vm15, %vm500_vm0  ;;  %vm478_vm15 = vcmp.ge.s32.totalorder %v1325_v44, %v1445_v1  ;;  %vm495_vm0 = vcmp.lt.s32.totalorder %v1325_v44, %v1455_v3 }
 0x20a   :  { %1017 = vmatpush3.msk.msra.mxu1 %vm518_vm14, %v1134_v31  ;;  %vm515_vm8 = vmand %vm482_vm2, %vm499_vm4  ;;  %vm477_vm2 = vcmp.ge.s32.totalorder %v1337_v46, %v1445_v1  ;;  %vm494_vm4 = vcmp.lt.s32.totalorder %v1337_v46, %v1455_v3  ;;  %p1091_p4 = pnand %p1090_p3, %p1084_p0 }
 0x20b   :  { %1018 = vmatprep.subr.mxu1 %v1133_v2  ;;  %vm514_vm11 = vmand %vm481_vm6, %vm498_vm7  ;;  %vm476_vm6 = vcmp.ge.s32.totalorder %v1349_v48, %v1445_v1  ;;  %vm493_vm7 = vcmp.lt.s32.totalorder %v1349_v48, %v1455_v3 }
 0x20c   :  { %1019 = vmatpush3.msk.msra.mxu1 %vm517_vm1, %v1134_v31  ;;  %vm513_vm14 = vmand %vm480_vm9, %vm497_vm10  ;;  %vm475_vm9 = vcmp.ge.s32.totalorder %v1368_v51, %v1445_v1  ;;  %vm492_vm10 = vcmp.lt.s32.totalorder %v1368_v51, %v1455_v3 }
 0x20d   :  { %1020 = vmatprep.subr.mxu1 %v1133_v2  ;;  %vm512_vm1 = vmand %vm479_vm12, %vm496_vm13  ;;  %vm474_vm12 = vcmp.ge.s32.totalorder %v1387_v54, %v1445_v1  ;;  %vm491_vm13 = vcmp.lt.s32.totalorder %v1387_v54, %v1455_v3 }
 0x20e   :  { %1021 = vmatpush3.msk.msra.mxu1 %vm516_vm5, %v1134_v31  ;;  %vm511_vm5 = vmand %vm478_vm15, %vm495_vm0  ;;  %vm473_vm15 = vcmp.ge.s32.totalorder %v1406_v56, %v1445_v1  ;;  %vm490_vm0 = vcmp.lt.s32.totalorder %v1406_v56, %v1455_v3 }
 0x20f   :  { %1022 = vmatprep.subr.mxu1 %v1133_v2 }
 0x210   :  { %1023 = vmatpush3.msk.msra.mxu1 %vm515_vm8, %v1134_v31  ;;  %vm510_vm8 = vmand %vm477_vm2, %vm494_vm4  ;;  %vm472_vm2 = vcmp.ge.s32.totalorder %v1212_v11, %v1445_v1  ;;  %vm489_vm4 = vcmp.lt.s32.totalorder %v1212_v11, %v1455_v3 }
 0x211   :  { %1024 = vmatprep.subr.mxu1 %v1133_v2 }
 0x212   :  { %1025 = vmatpush3.msk.msra.mxu1 %vm514_vm11, %v1134_v31  ;;  %vm509_vm11 = vmand %vm476_vm6, %vm493_vm7  ;;  %vm642_vm7 = vcmask 1042432  }
 0x213   :  { %1026 = vmatprep.subr.mxu1 %v1133_v2  ;;  %vm505_vm6 = vmand %vm472_vm2, %vm489_vm4  ;;  %1048 = vmatpush3.msk.msra.mxu0 %vm642_vm7, %v630_v5 }
 0x214   :  { %1027 = vmatpush3.msk.msra.mxu1 %vm513_vm14, %v1134_v31  ;;  %vm508_vm14 = vmand %vm475_vm9, %vm492_vm10  ;;  %1049 = vmatprep.subr.mxu0 %v1133_v2  ;;  %vm638_vm9 = vcmask 285696   ;;  %vm624_vm10 = vcmask 279552  }
 0x215   :  { %1028 = vmatprep.subr.mxu1 %v1133_v2  ;;  %1050 = vmatpush3.msra.mxu0 %v629_v6 }
 0x216   :  { %1029 = vmatpush3.msk.msra.mxu1 %vm512_vm1, %v1134_v31  ;;  %vm507_vm1 = vmand %vm474_vm12, %vm491_vm13  ;;  %1051 = vmatprep.subr.mxu0 %v1133_v2 }
 0x217   :  { %1030 = vmatprep.subr.mxu1 %v1133_v2  ;;  %1052 = vmatpush3.msra.mxu0 %v628_v7 }
 0x218   :  { %1031 = vmatpush3.msk.msra.mxu1 %vm511_vm5, %v1134_v31  ;;  %vm506_vm5 = vmand %vm473_vm15, %vm490_vm0  ;;  %1053 = vmatprep.subr.mxu0 %v1133_v2 }
 0x219   :  { %1032 = vmatprep.subr.mxu1 %v1133_v2  ;;  %1054 = vmatpush3.msra.mxu0 %v627_v8 }
 0x21a   :  { %1033 = vmatpush3.msk.msra.mxu1 %vm510_vm8, %v1134_v31  ;;  %1055 = vmatprep.subr.mxu0 %v1133_v2  ;;  %vm621_vm8 = vcmask 279808  }
 0x21b   :  { %1034 = vmatprep.subr.mxu1 %v1133_v2  ;;  %1056 = vmatpush3.msra.mxu0 %v626_v9 }
 0x21c   :  { %1035 = vmatpush3.msk.msra.mxu1 %vm509_vm11, %v1134_v31  ;;  %vm728_vm11 = vcmask 261120  }
 0x21d   :  { %1036 = vmatprep.subr.mxu1 %v1133_v2 }
 0x21e   :  { %1037 = vmatpush3.msk.msra.mxu1 %vm508_vm14, %v1134_v31 }
 0x21f   :  { %1038 = vmatprep.subr.mxu1 %v1133_v2 }
 0x220   :  { %1039 = vmatpush3.msk.msra.mxu1 %vm507_vm1, %v1134_v31 }
 0x221   :  { %1040 = vmatprep.subr.mxu1 %v1133_v2 }
 0x222   :  { %1041 = vmatpush3.msk.msra.mxu1 %vm506_vm5, %v1134_v31 }
 0x223   :  { %1042 = vmatprep.subr.mxu1 %v1133_v2 }
 0x224   :  { %1043 = vmatpush3.msk.msra.mxu1 %vm505_vm6, %v1134_v31 }
 0x225   :  { %1045 = vmatmul.mubr.f32.vlgmr.msra.gmra.mxu1 %v470_v4  ;;  %1060 = vmatprep.subr.mxu1 %v1133_v2 }
 0x226   :  { %1068 = vmatprep.mubr.msk.f32.mxu1 %vm1136_vm3, %v1133_v2  ;;  %1061 = vmatpush3.msra.mxu1 %v720_v13  ;;  %vm614_vm3 = vcmask 255104  }
 0x227   :  { %1062 = vmatprep.subr.mxu1 %v1133_v2 }
 0x228   :  { %1063 = vmatpush3.msra.mxu1 %v719_v20 }
 0x229   :  { %1064 = vmatprep.subr.mxu1 %v1133_v2 }
 0x22a   :  { %1065 = vmatpush3.msra.mxu1 %v718_v21 }
 0x22b   :  { %1066 = vmatprep.subr.mxu1 %v1133_v2 }
 0x22c   :  { %1067 = vmatpush3.msra.mxu1 %v717_v22 }
 0x2e5   :  { %v603_v10 = vpop.f32.mrf.mxu1 }
 0x2e6   :  { %v608_v11 = vmul.f32 0.125, %v603_v10 }
 0x2e7   :  { %v1046_v12 = vpop.f32.mrf.mxu1 }
 0x2e8   :  { %610 = vrot.lane.b32.xlu0 %v608_v11, %s1137_s10 }
 0x2ec   :  { %618 = vrot.lane.b32.xlu0 %v616_v14, %s1138_s4 }
 0x35a   :  { %v611_v16 = vpop.permute.xlu0 %610 }
 0x35b   :  { %v613_v17 = vadd.f32 %v611_v16, %v607_v15 }
 0x35d   :  { %615 = vst.msk [vmem:[#allocation5] sm:$0x3] %vm614_vm3, %v613_v17 }
 0x35e   :  { %v619_v18 = vpop.permute.xlu0 %618 }
 0x35f   :  { %622 = vst.msk [vmem:[#allocation5] sm:$0x3] %vm621_vm8, %v619_v18 }
 0x366   :  { %v623_v19 = vld [vmem:[#allocation5] sm:$0x3] }
 0x367   :  { %1058 = vmatmul.mubr.msk.f32.vlgmr.msra.gmra.mxu0 %vm638_vm9, %v623_v19  ;;  %625 = vst.msk [vmem:[#allocation8] sm:$0x3] %vm624_vm10, %v623_v19 }
 0x427   :  { %v712_v24 = vpop.f32.mrf.mxu0 }
 0x428   :  { %v713_v25 = vadd.f32 %v941_v23, %v712_v24 }
 0x429   :  { %v1059_v26 = vpop.f32.mrf.mxu0 }
 0x42a   :  { %v716_v27 = vmax.f32 %v713_v25, 0.0 }
 0x42c   :  { %1069 = vmatmul.mubr.msk.f32.vlgmr.msra.gmra.mxu1 %vm728_vm11, %v716_v27 }
 0x42d   :  { %1094 = shalt.err (!%p1091_p4)
}
 0x42e   :  { %833 = dma.vmem_to_hbm [thread:$0]  %s831_s0, 32, %s1611_s9, [#allocation9]   ;;  %v944_v2 = vld [vmem:[%s1609_s7] ss:$0 sm:$0xff]  ;;  %vm812_vm12 = vcmask 74752  }
 0x42f   :  { %s1140_s22 = smov [#allocation6]  }
 0x430   :  { %s820_s23 = sshll.u32 %s1140_s22, 4  ;;  %s821_s23 = int_to_ptr.vmem [resolvable:$true] %s820_s23 }
 0x431   :  { %s1103_s7 = scalar_lea.vmem %s821_s23, 32  ;;  %p1108_p6 = scmp.lt.s32.totalorder %s821_s23, %s821_s23 }
 0x432   :  { %p1104_p5 = scmp.ne.s32.totalorder %s821_s23, %s1103_s7  ;;  %p1109_p7 = scmp.lt.s32.totalorder %s1103_s7, %s1103_s7 }
 0x434   :  { %p1110_p8 = por %p1109_p7, %p1108_p6 }
 0x436   :  { %p1111_p9 = pnand %p1110_p8, %p1104_p5 }
 0x4ec   :  { %v798_v28 = vpop.f32.mrf.mxu1 }
 0x4ed   :  { %v799_v29 = vadd.f32 %v944_v2, %v798_v28 }
 0x4ee   :  { %v1070_v30 = vpop.f32.mrf.mxu1 }
 0x4ef   :  { %v802_v31 = vand.u32 2147483647, %v799_v29  ;;  %vm809_vm13 = vcmp.ge.f32.partialorder %v799_v29, 0.0 }
 0x4f1   :  { %v803_v32 = vsub.f32 0.0, %v802_v31 }
 0x4f3   :  { %v804_v33 = vmul.f32 1.442695, %v803_v32 }
 0x4f5   :  { %1079 = vpow2.f32 %v804_v33 }
 0x502   :  { %v1080_v34 = vpop.eup %1079 }
 0x503   :  { %v806_v35 = vadd.f32 1.0, %v1080_v34 }
 0x505   :  { %1081 = vrcp.f32 %v806_v35 }
 0x512   :  { %v1082_v36 = vpop.eup %1081 }
 0x513   :  { %v810_v37 = vsub.f32 1.0, %v1082_v36 }
 0x515   :  { %v811_v38 = vsel %vm809_vm13, %v1082_v36, %v810_v37 }
 0x516   :  { %813 = vst.msk [vmem:[#allocation6] sm:$0x3] %vm812_vm12, %v811_v38 }
 0x517   :  { %1114 = shalt.err (!%p1111_p9)
}
 0x518   :  { %823 = dma.vmem_to_hbm [thread:$0]  %s821_s23, 32, %s1610_s8, [#allocation7]  }
 0x519   :  { %1129 = dma.done.wait [#allocation7], 32  }
 0x51a   :  { %1130 = vsyncadd [#allocation7], 4294967264 }
 0x51b   :  { %1131 = dma.done.wait [#allocation9], 32  }
 0x51c   :  { %1132 = vsyncadd [#allocation9], 4294967264 }
 0x51d   :  { %840 = vsyncpa [#allocation7], 1 }
 0x51e   :  { %841 = vsyncpa [#allocation9], 1 }
 0x51f   :  { %842 = vsyncmov [#allocation4] }
 0x522   :  { %s843_s25 = vpop.sfrf %842 }
 0x523   :  { %p946_p10 = scmp.ne.s32.totalorder %s843_s25, 0 }
 0x525   :  { %847 = shalt.err (%p946_p10)  }
 0x526   :  { %849 = vsyncmov [#allocation4 + $0x1] }
 0x529   :  { %s850_s26 = vpop.sfrf %849 }
 0x52a   :  { %p947_p11 = scmp.ne.s32.totalorder %s850_s26, 0 }
 0x52c   :  { %854 = shalt.err (%p947_p11)  }
 0x52d   :  { %856 = vsyncmov [#allocation4 + $0x2] }
 0x530   :  { %s857_s27 = vpop.sfrf %856 }
 0x531   :  { %p948_p12 = scmp.ne.s32.totalorder %s857_s27, 0 }
 0x533   :  { %861 = shalt.err (%p948_p12)  }

</bundles_post_ra>
